<compile_context>
chip_gen: v5e
topology: v5e:2x2
jax: 0.10.0
libtpu: 0.0.40
codegen_flags: <defaults>
</compile_context>

<pallas_src>
import jax
import jax.numpy as jnp
from jax.experimental import pallas as pl
from jax.experimental.pallas import tpu as pltpu


def _awl_kernel(losses_ref, params_ref, out_ref):
    # losses_ref: (1, num) f32 in VMEM -- task losses.
    # params_ref: (1, num) f32 in VMEM -- learnable uncertainty params.
    # out_ref:    (1, 1)   f32 in SMEM -- scalar result.
    l = losses_ref[...]
    p = params_ref[...]
    p2 = p * p
    # Exact same math as the torch module: 0.5 / p^2 * loss + log(1 + p^2)
    terms = 0.5 * l / p2 + jnp.log(1.0 + p2)
    out_ref[0, 0] = jnp.sum(terms)


def _awl_forward_pallas(losses, params):
    num = losses.shape[0]
    l2d = losses.astype(jnp.float32).reshape(1, num)
    p2d = params.astype(jnp.float32).reshape(1, num)

    out = pl.pallas_call(
        _awl_kernel,
        out_shape=jax.ShapeDtypeStruct((1, 1), jnp.float32),
        in_specs=[
            pl.BlockSpec(memory_space=pltpu.MemorySpace.VMEM),
            pl.BlockSpec(memory_space=pltpu.MemorySpace.VMEM),
        ],
        out_specs=pl.BlockSpec(memory_space=pltpu.MemorySpace.SMEM),
        cost_estimate=pl.CostEstimate(
            flops=5 * num,              # mul, mul, div, mul, add (per task)
            transcendentals=2 * num,    # log + divide go through EUP
            bytes_accessed=8 * num + 4, # two f32 inputs + scalar output
        ),
    )(l2d, p2d)
    return out[0, 0]


@jax.custom_vjp
def automatic_weighted_loss(losses, params):
    """losses: (num,) f32 task losses; params: (num,) f32 learnable params."""
    return _awl_forward_pallas(losses, params)


def _awl_fwd(losses, params):
    return _awl_forward_pallas(losses, params), (losses, params)


def _awl_bwd(residuals, g):
    losses, params = residuals
    p = params.astype(jnp.float32)
    l = losses.astype(jnp.float32)
    p2 = p * p
    d_losses = g * (0.5 / p2)
    d_params = g * (-l / (p2 * p) + 2.0 * p / (1.0 + p2))
    return d_losses.astype(losses.dtype), d_params.astype(params.dtype)


automatic_weighted_loss.defvjp(_awl_fwd, _awl_bwd)


if __name__ == "__main__":
    num = 2
    # Parameter init matches torch.ones(num) in the module's __init__.
    params = jnp.ones((num,), dtype=jnp.float32)

    # Deterministic example "task losses" (scalars), e.g. loss1, loss2.
    key = jax.random.PRNGKey(0)
    losses = jax.random.uniform(key, (num,), dtype=jnp.float32, minval=0.5, maxval=3.0)

    result = automatic_weighted_loss(losses, params)
    jax.block_until_ready(result)

    # Pure-JAX reference of the same math (exact divide / log).
    p2 = params ** 2
    ref = jnp.sum(0.5 / p2 * losses + jnp.log(1.0 + p2))
    assert jnp.allclose(result, ref, rtol=1e-5, atol=1e-6), (result, ref)

    # Gradient parity (closed-form custom_vjp vs. autodiff of the jnp reference).
    def ref_fn(l, p):
        q = p ** 2
        return jnp.sum(0.5 / q * l + jnp.log(1.0 + q))

    g_l, g_p = jax.grad(automatic_weighted_loss, argnums=(0, 1))(losses, params)
    rg_l, rg_p = jax.grad(ref_fn, argnums=(0, 1))(losses, params)
    jax.block_until_ready((g_l, g_p))
    assert jnp.allclose(g_l, rg_l, rtol=1e-5, atol=1e-6), (g_l, rg_l)
    assert jnp.allclose(g_p, rg_p, rtol=1e-5, atol=1e-6), (g_p, rg_p)

    print("KERNEL_OK")
</pallas_src>

<mosaic_0001>
module attributes {stable_mosaic.version = 11 : i64} {
  func.func @_awl_kernel(%arg0: memref<1x2xf32, #tpu.memory_space<vmem>>, %arg1: memref<1x2xf32, #tpu.memory_space<vmem>>, %arg2: memref<1x1xf32, #tpu.memory_space<smem>>) attributes {dimension_semantics = [], scalar_prefetch = 0 : i64, scratch_operands = 0 : i64, tpu.core_type = #tpu.core_type<tc>} {
    %c0 = arith.constant 0 : index
    %c0_0 = arith.constant 0 : index
    %0 = vector.load %arg0[%c0, %c0_0] : memref<1x2xf32, #tpu.memory_space<vmem>>, vector<1x2xf32>
    %c0_1 = arith.constant 0 : index
    %c0_2 = arith.constant 0 : index
    %1 = vector.load %arg1[%c0_1, %c0_2] : memref<1x2xf32, #tpu.memory_space<vmem>>, vector<1x2xf32>
    %2 = arith.mulf %1, %1 : vector<1x2xf32>
    %cst = arith.constant 5.000000e-01 : f32
    %3 = vector.broadcast %cst : f32 to vector<1x2xf32>
    %4 = arith.mulf %3, %0 : vector<1x2xf32>
    %5 = arith.divf %4, %2 : vector<1x2xf32>
    %cst_3 = arith.constant 1.000000e+00 : f32
    %6 = vector.broadcast %cst_3 : f32 to vector<1x2xf32>
    %7 = arith.addf %6, %2 : vector<1x2xf32>
    %8 = math.log %7 : vector<1x2xf32>
    %9 = arith.addf %5, %8 : vector<1x2xf32>
    %10 = vector.shape_cast %9 : vector<1x2xf32> to vector<1x1x2xf32>
    %cst_4 = arith.constant dense<0.000000e+00> : vector<1xf32>
    %11 = vector.multi_reduction <add>, %10, %cst_4 [1, 2] : vector<1x1x2xf32> to vector<1xf32>
    %12 = vector.shape_cast %11 : vector<1xf32> to vector<1x1x1xf32>
    %13 = vector.extract %12[0, 0, 0] : f32 from vector<1x1x1xf32>
    %c0_5 = arith.constant 0 : index
    %c0_6 = arith.constant 0 : index
    %14 = memref.load %arg2[%c0_5, %c0_6] : memref<1x1xf32, #tpu.memory_space<smem>>
    memref.store %13, %arg2[%c0_5, %c0_6] : memref<1x1xf32, #tpu.memory_space<smem>>
    return
  }
}

</mosaic_0001>

<bundles_post_ra>
// kernel: tpu_custom_call.1
= control target key start
LH: loop header
LB: loop body
LE: loop exit
PB: predicated region body
PF: predicated region fallthrough
CT: control target
= control target key end

     0   :  { %7 = vsyncpa [#allocation3], 0  ;;  %s195_s0 = inlined_call_operand.hbm [shape: f32[1,2], index: 0, kind: input, shape index: {}]   ;;  %s196_s1 = inlined_call_operand.hbm [shape: f32[1,2], index: 1, kind: input, shape index: {}]   ;;  %s197_s2 = inlined_call_operand.hbm [shape: f32[1,1], index: 2, kind: output, shape index: {}]  }
   0x1   :  { %8 = vsyncpa [#allocation6], 0 }
   0x2   :  { %9 = vsyncpa [#allocation4], 0  ;;  %s15_s11 = sshll.u32 %s195_s0, 4  ;;  %s168_s12 = smov [#allocation2]   ;;  %s16_s11 = int_to_ptr.hbm [resolvable:$true] %s15_s11 }
   0x3   :  { %s17_s13 = sshll.u32 %s168_s12, 4  ;;  %s26_s16 = sshll.u32 %s196_s1, 4  ;;  %s18_s13 = int_to_ptr.vmem [resolvable:$true] %s17_s13  ;;  %s27_s16 = int_to_ptr.hbm [resolvable:$true] %s26_s16 }
   0x4   :  { %20 = dma.hbm_to_vmem [thread:$0]  %s16_s11, 16, %s18_s13, [#allocation3]  }
   0x5   :  { %s169_s17 = smov [#allocation5]  }
   0x6   :  { %s28_s18 = sshll.u32 %s169_s17, 4  ;;  %s29_s18 = int_to_ptr.vmem [resolvable:$true] %s28_s18 }
   0x7   :  { %31 = dma.hbm_to_vmem [thread:$0]  %s27_s16, 16, %s29_s18, [#allocation6]  }
   0x8   :  { %162 = dma.done.wait [#allocation3], 16  }
   0x9   :  { %163 = vsyncadd [#allocation3], 4294967280 }
   0xa   :  { %164 = dma.done.wait [#allocation6], 16  }
   0xb   :  { %165 = vsyncadd [#allocation6], 4294967280  ;;  %v41_v0 = vld [vmem:[#allocation5] sm:$0x1]  ;;  %v40_v8 = vld [vmem:[#allocation2] sm:$0x1] }
   0xc   :  { %v42_v1 = vmul.f32 %v41_v0, %v41_v0  ;;  %v43_v12 = vmul.f32 0.5, %v40_v8  ;;  %vm63_vm4 = vcmask 8192   ;;  %s81_s19 = sshll.u32 %s197_s2, 4  ;;  %s170_s21 = smov [#allocation7]   ;;  %s82_s19 = int_to_ptr.hbm [resolvable:$true] %s81_s19 }
   0xe   :  { %98 = vrcp.f32 %v42_v1  ;;  %v59_v2 = vadd.f32 1.0, %v42_v1  ;;  %v55_v5 = vand.u32 2147483648, %v42_v1  ;;  %vm49_vm0 = vweird.f32 %v42_v1 }
   0xf   :  { %v53_v7 = vand.u32 2147483647, %v42_v1 }
  0x10   :  { %100 = vlog2.f32 %v59_v2  ;;  %v56_v11 = vor.u32 1.1754944e-38, %v55_v5 }
  0x11   :  { %vm54_vm3 = vcmp.eq.f32.partialorder %v53_v7, 8.507059e+37 }
  0x14   :  { %v99_v3 = vpop.eup %98 }
  0x15   :  { %v45_v4 = vmul.f32 %v99_v3, %v42_v1  ;;  %vm50_vm1 = vweird.f32 %v99_v3 }
  0x16   :  { %v101_v10 = vpop.eup %100  ;;  %vm51_vm2 = vmor %vm49_vm0, %vm50_vm1 }
  0x17   :  { %v46_v6 = vsub.f32 1.0, %v45_v4  ;;  %v61_v15 = vmul.f32 0.6931472, %v101_v10 }
  0x19   :  { %v47_v9 = vmul.f32 %v99_v3, %v46_v6 }
  0x1b   :  { %v48_v13 = vadd.f32 %v99_v3, %v47_v9 }
  0x1d   :  { %v52_v14 = vsel %vm51_vm2, %v99_v3, %v48_v13 }
  0x1e   :  { %v57_v16 = vsel %vm54_vm3, %v56_v11, %v52_v14 }
  0x1f   :  { %v58_v17 = vmul.f32 %v57_v16, %v43_v12 }
  0x21   :  { %v62_v18 = vadd.f32 %v61_v15, %v58_v17 }
  0x23   :  { %v64_v19 = vsel %vm63_vm4, %v62_v18, 0.0 }
  0x24   :  { %65 = vadd.xlane.f32.xlu0 %v64_v19 }
  0x97   :  { %v66_v20 = vpop.xlane.xlu0 %65 }
  0x98   :  { %v67_v21 = vrot.slane %v66_v20, 4 }
  0x9a   :  { %v68_v22 = vadd.f32 %v67_v21, %v66_v20 }
  0x9c   :  { %v69_v23 = vrot.slane %v68_v22, 2 }
  0x9e   :  { %v70_v24 = vadd.f32 %v69_v23, %v68_v22 }
  0xa0   :  { %v71_v25 = vrot.slane %v70_v24, 1 }
  0xa2   :  { %v72_v26 = vadd.f32 %v71_v25, %v70_v24 }
  0xa4   :  { %93 = vpush %v72_v26 }
  0xd5   :  { %s94_s20 = spop %93 }
  0xd6   :  { %75 = sst [smem:[#allocation7]] %s94_s20 }
  0xd7   :  { %84 = dma.smem_to_hbm %s170_s21, 16, %s82_s19, [#allocation4]  }
  0xd8   :  { %166 = dma.done.wait [#allocation4], 16  }
  0xd9   :  { %167 = vsyncadd [#allocation4], 4294967280 }
  0xda   :  { %89 = sfence }
  0xdb   :  { %90 = vsyncpa [#allocation3], 1 }
  0xdc   :  { %91 = vsyncpa [#allocation6], 1 }
  0xdd   :  { %92 = vsyncpa [#allocation4], 1 }

</bundles_post_ra>
